<compile_context>
chip_gen: v5e
topology: v5e:2x2
jax: 0.10.0
libtpu: 0.0.40
codegen_flags: <defaults>
</compile_context>

<pallas_src>
import jax
import jax.numpy as jnp
from jax.experimental import pallas as pl
from jax.experimental.pallas import tpu as pltpu


def _conv_stats_kernel(a_ref, w_ref, y_ref, sum_ref, ssq_ref):
    """im2col matmul on a (C_out, tm) output tile + per-tile BN partial sums."""
    a = a_ref[...].astype(jnp.float32)                       # bf16 {-1,0,1} -> f32 (exact)
    y = jnp.dot(w_ref[...], a, preferred_element_type=jnp.float32)   # (C_out, tm) on MXU
    y_ref[...] = y
    # lane-axis reductions (XLU) -> per-tile partials, written to this tile's row
    sum_ref[...] = jnp.sum(y, axis=1)[None, :]               # (1, C_out)
    ssq_ref[...] = jnp.sum(y * y, axis=1)[None, :]           # (1, C_out)


def _bn_apply_kernel(y_ref, scale_ref, shift_ref, o_ref):
    """Elementwise BN: y * (gamma/std) + (beta - mean*gamma/std), per-sublane scalars."""
    o_ref[...] = y_ref[...] * scale_ref[...] + shift_ref[...]


def relu_conv_bn(x, weight, gamma, beta, *, stride, padding, eps=1e-5, tm_max=1024):
    """x: (N, C_in, H, W) f32; weight: (C_out, C_in, KH, KW); gamma/beta: (C_out,)."""
    N, C_in, H, W = x.shape
    C_out, _, KH, KW = weight.shape
    H_out = (H + 2 * padding - KH) // stride + 1
    W_out = (W + 2 * padding - KW) // stride + 1
    M = N * H_out * W_out
    K = C_in * KH * KW

    assert tm_max % 128 == 0
    m_aligned = pl.cdiv(M, 128) * 128
    tm = min(tm_max, m_aligned)                 # multiple of 128, lane-dense
    m_pad = pl.cdiv(M, tm) * tm
    num_tiles = m_pad // tm

    # --- glue: sign-activation first, then bf16 im2col (pad-zero commutes with sign) ---
    xs = jnp.sign(x).astype(jnp.bfloat16)       # BinaryActivation.forward, exact in bf16
    x_pad = jnp.pad(xs, ((0, 0), (0, 0), (padding, padding), (padding, padding)))
    cols = []
    for i in range(KH):
        for j in range(KW):
            cols.append(x_pad[:, :, i:i + stride * H_out:stride, j:j + stride * W_out:stride])
    patches = jnp.stack(cols, axis=2)                         # (N, C_in, KH*KW, H_out, W_out)
    aT = patches.transpose(1, 2, 0, 3, 4).reshape(K, M)       # (K, M), K=(c_in,kh,kw), M=(n,h,w)
    if m_pad != M:
        # zero columns -> 0 conv output -> contribute 0 to the BN sums
        aT = jnp.pad(aT, ((0, 0), (0, m_pad - M)))

    w2d = weight.reshape(C_out, K).astype(jnp.float32)        # (C_out, K), resident, f32

    grid = (num_tiles,)

    # --- pass 1: conv (as matmul) + per-tile BN partial statistics, fully parallel grid ---
    yT, part_sum, part_ssq = pl.pallas_call(
        _conv_stats_kernel,
        out_shape=(
            jax.ShapeDtypeStruct((C_out, m_pad), jnp.float32),
            jax.ShapeDtypeStruct((num_tiles, C_out), jnp.float32),
            jax.ShapeDtypeStruct((num_tiles, C_out), jnp.float32),
        ),
        grid=grid,
        in_specs=[
            pl.BlockSpec((K, tm), lambda i: (0, i)),          # A^T tile, lane axis = M
            pl.BlockSpec((C_out, K), lambda i: (0, 0)),       # W resident
        ],
        out_specs=(
            pl.BlockSpec((C_out, tm), lambda i: (0, i)),      # y^T tile, lane-dense store
            pl.BlockSpec((1, C_out), lambda i: (i, 0)),       # per-tile partial sum
            pl.BlockSpec((1, C_out), lambda i: (i, 0)),       # per-tile partial sum-of-squares
        ),
        compiler_params=pltpu.CompilerParams(dimension_semantics=("parallel",)),
    )(aT, w2d)

    # --- tiny per-channel scalars (BatchNorm training-mode statistics), f32 in the wrapper ---
    s = jnp.sum(part_sum, axis=0)               # (C_out,)
    q = jnp.sum(part_ssq, axis=0)               # (C_out,)
    mean = s / M
    var = q / M - mean * mean                   # biased variance, as BN uses for normalization
    inv_std = jax.lax.rsqrt(var + eps)
    scale = (gamma.astype(jnp.float32) * inv_std)[:, None]            # (C_out, 1)
    shift = (beta.astype(jnp.float32) - mean * gamma.astype(jnp.float32) * inv_std)[:, None]

    # --- pass 2: elementwise BN apply, reusing the y buffer (input_output_aliases) ---
    outT = pl.pallas_call(
        _bn_apply_kernel,
        out_shape=jax.ShapeDtypeStruct((C_out, m_pad), jnp.float32),
        grid=grid,
        in_specs=[
            pl.BlockSpec((C_out, tm), lambda i: (0, i)),
            pl.BlockSpec((C_out, 1), lambda i: (0, 0)),       # per-sublane scalar, lane-broadcast
            pl.BlockSpec((C_out, 1), lambda i: (0, 0)),
        ],
        out_specs=pl.BlockSpec((C_out, tm), lambda i: (0, i)),
        input_output_aliases={0: 0},                          # reuse y's HBM buffer for the output
        compiler_params=pltpu.CompilerParams(dimension_semantics=("parallel",)),
    )(yT, scale, shift)

    # back to NCHW
    out = outT[:, :M].reshape(C_out, N, H_out, W_out).transpose(1, 0, 2, 3)
    return out


def _reference(x, weight, gamma, beta, *, stride, padding, eps=1e-5):
    xs = jnp.sign(x)
    conv = jax.lax.conv_general_dilated(
        xs, weight, (stride, stride), [(padding, padding), (padding, padding)],
        dimension_numbers=("NCHW", "OIHW", "NCHW"))
    mean = conv.mean(axis=(0, 2, 3), keepdims=True)
    var = conv.var(axis=(0, 2, 3), keepdims=True)   # biased
    return gamma[None, :, None, None] * (conv - mean) * jax.lax.rsqrt(var + eps) \
        + beta[None, :, None, None]


if __name__ == "__main__":
    # ReLUConvBN(C_in=4, C_out=8, kernel_size=3, stride=1, padding=1, affine=True)
    C_in, C_out, KH, KW, stride, padding = 4, 8, 3, 3, 1, 1
    N, H, W = 2, 16, 16

    key = jax.random.PRNGKey(0)
    kx, kw = jax.random.split(key)
    x = jax.random.normal(kx, (N, C_in, H, W), dtype=jnp.float32)
    # deterministic synthetic parameter init (conv has no bias)
    weight = 0.1 * jax.random.normal(kw, (C_out, C_in, KH, KW), dtype=jnp.float32)
    gamma = 1.0 + 0.05 * jnp.arange(C_out, dtype=jnp.float32)   # affine scale
    beta = 0.01 * jnp.arange(C_out, dtype=jnp.float32)          # affine shift

    out = relu_conv_bn(x, weight, gamma, beta, stride=stride, padding=padding)
    out = jax.block_until_ready(out)

    ref = _reference(x, weight, gamma, beta, stride=stride, padding=padding)
    assert out.shape == (N, C_out, H, W), out.shape
    assert jnp.allclose(out, ref, atol=1e-4, rtol=1e-4), float(jnp.abs(out - ref).max())

    print("KERNEL_OK")
</pallas_src>

<mosaic_0001>
module attributes {stable_mosaic.version = 11 : i64} {
  func.func @_conv_stats_kernel(%arg0: i32, %arg1: memref<36x512xbf16, #tpu.memory_space<vmem>>, %arg2: memref<8x36xf32, #tpu.memory_space<vmem>>, %arg3: memref<8x512xf32, #tpu.memory_space<vmem>>, %arg4: memref<1x8xf32, #tpu.memory_space<vmem>>, %arg5: memref<1x8xf32, #tpu.memory_space<vmem>>) attributes {dimension_semantics = [#tpu.dimension_semantics<parallel>], iteration_bounds = array<i64: 1>, scalar_prefetch = 0 : i64, scratch_operands = 0 : i64, tpu.core_type = #tpu.core_type<tc>, window_params = [{transform_indices = @transform_0, window_bounds = array<i64: 36, 512>}, {pipeline_mode = #tpu.pipeline_mode<synchronous>, transform_indices = @transform_1, window_bounds = array<i64: 8, 36>}, {transform_indices = @transform_2, window_bounds = array<i64: 8, 512>}, {transform_indices = @transform_3, window_bounds = array<i64: 1, 8>}, {transform_indices = @transform_4, window_bounds = array<i64: 1, 8>}]} {
    %c0 = arith.constant 0 : index
    %c0_0 = arith.constant 0 : index
    %0 = vector.load %arg1[%c0, %c0_0] : memref<36x512xbf16, #tpu.memory_space<vmem>>, vector<36x512xbf16>
    %1 = arith.extf %0 : vector<36x512xbf16> to vector<36x512xf32>
    %c0_1 = arith.constant 0 : index
    %c0_2 = arith.constant 0 : index
    %2 = vector.load %arg2[%c0_1, %c0_2] : memref<8x36xf32, #tpu.memory_space<vmem>>, vector<8x36xf32>
    %cst = arith.constant dense<0.000000e+00> : vector<8x512xf32>
    %3 = tpu.matmul %2, %1, %cst {dimension_numbers = #tpu.dot_dimension_numbers<[1], [0], [0], [1], [0, 0, 1, 1], [], []>} : vector<8x36xf32>, vector<36x512xf32>, vector<8x512xf32> -> vector<8x512xf32>
    %c0_3 = arith.constant 0 : index
    %c0_4 = arith.constant 0 : index
    %4 = vector.load %arg3[%c0_3, %c0_4] : memref<8x512xf32, #tpu.memory_space<vmem>>, vector<8x512xf32>
    tpu.vector_store %arg3[%c0_3, %c0_4], %3 {strides = array<i32>} : memref<8x512xf32, #tpu.memory_space<vmem>>, vector<8x512xf32>,
    %cst_5 = arith.constant dense<0.000000e+00> : vector<8xf32>
    %5 = vector.multi_reduction <add>, %3, %cst_5 [1] : vector<8x512xf32> to vector<8xf32>
    %6 = vector.shape_cast %5 : vector<8xf32> to vector<1x8xf32>
    %c0_6 = arith.constant 0 : index
    %c0_7 = arith.constant 0 : index
    %7 = vector.load %arg4[%c0_6, %c0_7] : memref<1x8xf32, #tpu.memory_space<vmem>>, vector<1x8xf32>
    tpu.vector_store %arg4[%c0_6, %c0_7], %6 {strides = array<i32>} : memref<1x8xf32, #tpu.memory_space<vmem>>, vector<1x8xf32>,
    %8 = arith.mulf %3, %3 : vector<8x512xf32>
    %cst_8 = arith.constant dense<0.000000e+00> : vector<8xf32>
    %9 = vector.multi_reduction <add>, %8, %cst_8 [1] : vector<8x512xf32> to vector<8xf32>
    %10 = vector.shape_cast %9 : vector<8xf32> to vector<1x8xf32>
    %c0_9 = arith.constant 0 : index
    %c0_10 = arith.constant 0 : index
    %11 = vector.load %arg5[%c0_9, %c0_10] : memref<1x8xf32, #tpu.memory_space<vmem>>, vector<1x8xf32>
    tpu.vector_store %arg5[%c0_9, %c0_10], %10 {strides = array<i32>} : memref<1x8xf32, #tpu.memory_space<vmem>>, vector<1x8xf32>,
    return
  }
  func.func @transform_0(%arg0: i32) -> (i32, i32) {
    %c0_i32 = arith.constant 0 : i32
    %c0_i32_0 = arith.constant 0 : i32
    return %c0_i32, %arg0 : i32, i32
  }
  func.func @transform_1(%arg0: i32) -> (i32, i32) {
    %c0_i32 = arith.constant 0 : i32
    %c0_i32_0 = arith.constant 0 : i32
    %c0_i32_1 = arith.constant 0 : i32
    return %c0_i32, %c0_i32_0 : i32, i32
  }
  func.func @transform_2(%arg0: i32) -> (i32, i32) {
    %c0_i32 = arith.constant 0 : i32
    %c0_i32_0 = arith.constant 0 : i32
    return %c0_i32, %arg0 : i32, i32
  }
  func.func @transform_3(%arg0: i32) -> (i32, i32) {
    %c0_i32 = arith.constant 0 : i32
    %c0_i32_0 = arith.constant 0 : i32
    return %arg0, %c0_i32 : i32, i32
  }
  func.func @transform_4(%arg0: i32) -> (i32, i32) {
    %c0_i32 = arith.constant 0 : i32
    %c0_i32_0 = arith.constant 0 : i32
    return %arg0, %c0_i32 : i32, i32
  }
}

</mosaic_0001>

<bundles_post_ra>
// kernel: tpu_custom_call.1
= control target key start
LH: loop header
LB: loop body
LE: loop exit
PB: predicated region body
PF: predicated region fallthrough
CT: control target
= control target key end

     0   :  { %10 = vsyncpa [#allocation3], 0  ;;  %s446_s0 = inlined_call_operand.hbm [shape: bf16[36,512], index: 0, kind: input, shape index: {}]   ;;  %s447_s1 = inlined_call_operand.hbm [shape: f32[8,36], index: 1, kind: input, shape index: {}]   ;;  %s448_s2 = inlined_call_operand.hbm [shape: f32[8,512], index: 2, kind: output, shape index: {0}]   ;;  %s449_s3 = inlined_call_operand.hbm [shape: f32[1,8], index: 3, kind: output, shape index: {1}]   ;;  %s450_s4 = inlined_call_operand.hbm [shape: f32[1,8], index: 4, kind: output, shape index: {2}]  }
   0x1   :  { %11 = vsyncpa [#allocation6], 0 }
   0x2   :  { %12 = vsyncpa [#allocation4], 0 }
   0x3   :  { %13 = vsyncpa [#allocation9], 0  ;;  %s18_s17 = sshll.u32 %s446_s0, 4  ;;  %s395_s18 = smov [#allocation2]   ;;  %s19_s17 = int_to_ptr.hbm [resolvable:$true] %s18_s17 }
   0x4   :  { %s20_s19 = sshll.u32 %s395_s18, 4  ;;  %s32_s22 = sshll.u32 %s447_s1, 4  ;;  %s21_s19 = int_to_ptr.vmem [resolvable:$true] %s20_s19  ;;  %s33_s22 = int_to_ptr.hbm [resolvable:$true] %s32_s22 }
   0x5   :  { %s396_s23 = smov 256   ;;  %s397_s24 = smov 16  }
   0x6   :  { %26 = dma.hbm_to_vmem [thread:$0]  %s19_s17, 1280, %s21_s19, [#allocation3], %s396_s23, %s396_s23, %s397_s24  }
   0x7   :  { %s398_s25 = smov [#allocation5]  }
   0x8   :  { %s34_s26 = sshll.u32 %s398_s25, 4  ;;  %s35_s26 = int_to_ptr.vmem [resolvable:$true] %s34_s26 }
   0x9   :  { %37 = dma.hbm_to_vmem [thread:$0]  %s33_s22, 128, %s35_s26, [#allocation6]  }
   0xa   :  { %387 = dma.done.wait [#allocation3], 1280  }
   0xb   :  { %388 = vsyncadd [#allocation3], 4294966016 }
   0xc   :  { %389 = dma.done.wait [#allocation6], 128  }
   0xd   :  { %390 = vsyncadd [#allocation6], 4294967168  ;;  %v55_v0 = vld [vmem:[#allocation2 + $0x48] sm:$0x33]  ;;  %vm81_vm0 = vcmask 1043456   ;;  %v53_v1 = vld [vmem:[#allocation2 + $0x38] sm:$0xff]  ;;  %v184_v45 = vlaneseq }
   0xe   :  { %v54_v2 = vld [vmem:[#allocation2 + $0x40] sm:$0x33]  ;;  %v74_v3 = vunpack.c.l.bf16 %v55_v0  ;;  %v70_v4 = vunpack.c.l.bf16 %v53_v1  ;;  %v75_v5 = vunpack.c.h.bf16 %v55_v0  ;;  %v51_v7 = vld [vmem:[#allocation2 + $0x28] sm:$0xff]  ;;  %v52_v8 = vld [vmem:[#allocation2 + $0x30] sm:$0xff]  ;;  %v71_v10 = vunpack.c.h.bf16 %v53_v1  ;;  %s210_s27 = sshll.u32 %s448_s2, 4  ;;  %s399_s28 = smov [#allocation7]   ;;  %s211_s27 = int_to_ptr.hbm [resolvable:$true] %s210_s27 }
   0xf   :  { %v72_v6 = vunpack.c.l.bf16 %v54_v2  ;;  %v73_v9 = vunpack.c.h.bf16 %v54_v2  ;;  %v68_v11 = vunpack.c.l.bf16 %v52_v8  ;;  %v49_v12 = vld [vmem:[#allocation2 + $0x18] sm:$0xff]  ;;  %v50_v13 = vld [vmem:[#allocation2 + $0x20] sm:$0xff]  ;;  %v66_v14 = vunpack.c.l.bf16 %v51_v7  ;;  %v48_v17 = vld [vmem:[#allocation2 + $0x10] sm:$0xff]  ;;  %s208_s29 = sshll.u32 %s399_s28, 4  ;;  %s400_s30 = smov [#allocation8]   ;;  %s209_s29 = int_to_ptr.vmem [resolvable:$true] %s208_s29 }
  0x10   :  { %256 = vmatpush.msk.msra.mxu2 %vm81_vm0, %v74_v3  ;;  %258 = vmatpush.msk.msra.mxu3 %vm81_vm0, %v75_v5  ;;  %v69_v15 = vunpack.c.h.bf16 %v52_v8  ;;  %v67_v16 = vunpack.c.h.bf16 %v51_v7  ;;  %v64_v18 = vunpack.c.l.bf16 %v50_v13  ;;  %v65_v19 = vunpack.c.h.bf16 %v50_v13  ;;  %v47_v20 = vld [vmem:[#allocation2 + $0x8] sm:$0xff]  ;;  %v46_v25 = vld [vmem:[#allocation2] sm:$0xff]  ;;  %v76_v28 = vld [vmem:[#allocation5] sm:$0xff]  ;;  %s219_s5 = sshll.u32 %s400_s30, 4  ;;  %s221_s8 = sshll.u32 %s449_s3, 4  ;;  %s220_s5 = int_to_ptr.vmem [resolvable:$true] %s219_s5  ;;  %s222_s8 = int_to_ptr.hbm [resolvable:$true] %s221_s8 }
  0x11   :  { %252 = vmatpush.msk.msra.mxu0 %vm81_vm0, %v72_v6  ;;  %254 = vmatpush.msk.msra.mxu1 %vm81_vm0, %v73_v9  ;;  %v62_v21 = vunpack.c.l.bf16 %v49_v12  ;;  %v63_v22 = vunpack.c.h.bf16 %v49_v12  ;;  %v60_v23 = vunpack.c.l.bf16 %v48_v17  ;;  %v61_v24 = vunpack.c.h.bf16 %v48_v17  ;;  %s401_s2 = smov [#allocation10]   ;;  %s232_s12 = sshll.u32 %s450_s4, 4  ;;  %s233_s12 = int_to_ptr.hbm [resolvable:$true] %s232_s12 }
  0x12   :  { %146 = vmatpush.msra.mxu2 %v70_v4  ;;  %166 = vmatpush.msra.mxu3 %v71_v10  ;;  %v58_v26 = vunpack.c.l.bf16 %v47_v20  ;;  %v59_v27 = vunpack.c.h.bf16 %v47_v20  ;;  %vm77_vm1 = vcmask 293888   ;;  %v56_v29 = vunpack.c.l.bf16 %v46_v25  ;;  %s230_s9 = sshll.u32 %s401_s2, 4  ;;  %s231_s9 = int_to_ptr.vmem [resolvable:$true] %s230_s9 }
  0x13   :  { %106 = vmatpush.msra.mxu0 %v68_v11  ;;  %126 = vmatpush.msra.mxu1 %v69_v15  ;;  %v57_v30 = vunpack.c.h.bf16 %v46_v25  ;;  %v185_v46 = vand.u32 127, %v184_v45  ;;  %vm188_vm2 = vcmask 57344  }
  0x14   :  { %147 = vmatpush.msra.mxu2 %v66_v14  ;;  %167 = vmatpush.msra.mxu3 %v67_v16 }
  0x15   :  { %107 = vmatpush.msra.mxu0 %v64_v18  ;;  %127 = vmatpush.msra.mxu1 %v65_v19 }
  0x16   :  { %148 = vmatpush.msra.mxu2 %v62_v21  ;;  %168 = vmatpush.msra.mxu3 %v63_v22 }
  0x17   :  { %108 = vmatpush.msra.mxu0 %v60_v23  ;;  %128 = vmatpush.msra.mxu1 %v61_v24 }
  0x18   :  { %149 = vmatpush.msra.mxu2 %v58_v26  ;;  %169 = vmatpush.msra.mxu3 %v59_v27 }
  0x19   :  { %257 = vmatmul.msk.f32.vlgmr.msra.gmra.mxu2 %vm77_vm1, %v76_v28  ;;  %259 = vmatmul.msk.f32.vlgmr.msra.gmra.mxu3 %vm77_vm1, %v76_v28 }
  0x1a   :  { %109 = vmatpush.msra.mxu0 %v56_v29  ;;  %129 = vmatpush.msra.mxu1 %v57_v30 }
  0x1b   :  { %253 = vmatmul.msk.f32.vlgmr.msra.gmra.mxu0 %vm77_vm1, %v76_v28  ;;  %255 = vmatmul.msk.f32.vlgmr.msra.gmra.mxu1 %vm77_vm1, %v76_v28 }
  0x98   :  { %v111_v31 = vpop.f32.mrf.mxu0  ;;  %v131_v32 = vpop.f32.mrf.mxu1 }
  0x99   :  { %174 = vst [vmem:[#allocation7] sm:$0xff] %v111_v31  ;;  %v178_v33 = vadd.f32 %v131_v32, %v111_v31  ;;  %v190_v34 = vmul.f32 %v111_v31, %v111_v31  ;;  %v191_v35 = vmul.f32 %v131_v32, %v131_v32 }
  0x9a   :  { %175 = vst [vmem:[#allocation7 + $0x8] sm:$0xff] %v131_v32 }
  0x9b   :  { %v194_v39 = vadd.f32 %v191_v35, %v190_v34 }
  0x9c   :  { %v151_v36 = vpop.f32.mrf.mxu2  ;;  %v171_v37 = vpop.f32.mrf.mxu3 }
  0x9d   :  { %176 = vst [vmem:[#allocation7 + $0x10] sm:$0xff] %v151_v36  ;;  %v179_v38 = vadd.f32 %v178_v33, %v151_v36  ;;  %v192_v40 = vmul.f32 %v151_v36, %v151_v36  ;;  %v193_v42 = vmul.f32 %v171_v37, %v171_v37 }
  0x9e   :  { %177 = vst [vmem:[#allocation7 + $0x18] sm:$0xff] %v171_v37 }
  0x9f   :  { %v180_v41 = vadd.f32 %v179_v38, %v171_v37  ;;  %213 = dma.vmem_to_hbm [thread:$0]  %s209_s29, 512, %s211_s27, [#allocation4]   ;;  %v195_v43 = vadd.f32 %v194_v39, %v192_v40 }
  0xa1   :  { %181 = vadd.xlane.f32.xlu0 %v180_v41  ;;  %v196_v44 = vadd.f32 %v195_v43, %v193_v42 }
  0xa9   :  { %197 = vadd.xlane.f32.xlu0 %v196_v44 }
 0x114   :  { %v182_v47 = vpop.xlane.xlu0 %181 }
 0x115   :  { %v186_v48 = vperm.slane %v182_v47, %v185_v46 }
 0x117   :  { %189 = vst.msk [vmem:[#allocation8] sm:$0x1] %vm188_vm2, %v186_v48 }
 0x118   :  { %224 = dma.vmem_to_hbm [thread:$0]  %s220_s5, 16, %s222_s8, [#allocation9]  }
 0x11c   :  { %v198_v49 = vpop.xlane.xlu0 %197 }
 0x11d   :  { %v200_v50 = vperm.slane %v198_v49, %v185_v46 }
 0x11f   :  { %202 = vst.msk [vmem:[#allocation10] sm:$0x1] %vm188_vm2, %v200_v50 }
 0x120   :  { %235 = dma.vmem_to_hbm [thread:$0]  %s231_s9, 16, %s233_s12, [#allocation9]  }
 0x121   :  { %391 = dma.done.wait [#allocation4], 512  }
 0x122   :  { %392 = vsyncadd [#allocation4], 4294966784 }
 0x123   :  { %393 = dma.done.wait [#allocation9], 32  }
 0x124   :  { %394 = vsyncadd [#allocation9], 4294967264 }
 0x125   :  { %248 = vsyncpa [#allocation3], 1 }
 0x126   :  { %249 = vsyncpa [#allocation6], 1 }
 0x127   :  { %250 = vsyncpa [#allocation4], 1 }
 0x128   :  { %251 = vsyncpa [#allocation9], 1 }

</bundles_post_ra>
